<compile_context>
chip_gen: v7x
topology: tpu7x:2x2x1
jax: 0.10.0
libtpu: 0.0.40
codegen_flags: <defaults>
</compile_context>

<pallas_src>
import functools

import jax
import jax.numpy as jnp
from jax.experimental import pallas as pl
from jax.experimental.pallas import tpu as pltpu


def _round_up(v: int, m: int) -> int:
    return (v + m - 1) // m * m


def _pad_granularity(dim: int) -> int:
    # 256 fills v6e/v7x's 2x256x256 MXU when the dim is big enough; for small
    # dims (and on v5e's 128-wide MXU) 128 avoids zero-padding waste.
    return 256 if dim >= 256 else 128


def _pad(dim: int) -> int:
    return _round_up(dim, _pad_granularity(dim))


# ----------------------------------------------------------------------------
# Fused Pallas kernel: entire encoder on one VMEM-resident activation.
#   h0 = X ;  h_{l+1} = ReLU(A @ (h_l @ W_l) + b_l)  for l in [0, n_layers)
#   out = A @ (h @ W_head) + b_head   where W_head = [W_mu | W_logvar]
# ----------------------------------------------------------------------------
def encoder_fused_kernel(a_ref, x_ref, w0_ref, wr_ref, b_ref, wh_ref, bh_ref,
                         o_ref, *, n_layers: int):
    a = a_ref[...]                                   # [Np, Np]  bf16
    # Layer 0: first-layer weight kept at its own (narrow) contraction size.
    xw = jnp.dot(x_ref[...], w0_ref[...], preferred_element_type=jnp.float32)
    agg = jnp.dot(a, xw.astype(jnp.bfloat16), preferred_element_type=jnp.float32)
    h = jnp.maximum(agg + b_ref[0], 0.0).astype(jnp.bfloat16)
    # Remaining conv1 blocks (static unroll; n_layers is compile-time).
    for l in range(1, n_layers):
        xw = jnp.dot(h, wr_ref[l - 1], preferred_element_type=jnp.float32)
        agg = jnp.dot(a, xw.astype(jnp.bfloat16),
                      preferred_element_type=jnp.float32)
        h = jnp.maximum(agg + b_ref[l], 0.0).astype(jnp.bfloat16)
    # Fused mu/logvar head: one matmul against the concatenated head weights.
    xw = jnp.dot(h, wh_ref[...], preferred_element_type=jnp.float32)
    out = jnp.dot(a, xw.astype(jnp.bfloat16), preferred_element_type=jnp.float32)
    # Note: padded rows of A are zero, so padded output rows hold b_head only;
    # they are sliced away in the wrapper and must not be assumed zero.
    o_ref[...] = (out + bh_ref[...]).astype(o_ref.dtype)


# ----------------------------------------------------------------------------
# Glue: GCN normalized adjacency (plain JAX, tiny graph setup)
# ----------------------------------------------------------------------------
def normalized_adjacency(edge_index, num_nodes):
    # PyG GCNConv (flow='source_to_target'): node dst = edge_index[1] aggregates
    # messages from src = edge_index[0]  ->  dense A[dst, src] = 1.
    a = jnp.zeros((num_nodes, num_nodes), jnp.float32)
    a = a.at[edge_index[1], edge_index[0]].add(1.0)   # .add keeps duplicate edges
    a = a + jnp.eye(num_nodes, dtype=jnp.float32)     # self-loops
    deg = jnp.sum(a, axis=1)                          # matches gcn_norm degree
    d_inv_sqrt = jax.lax.rsqrt(deg)
    return a * d_inv_sqrt[:, None] * d_inv_sqrt[None, :]


# ----------------------------------------------------------------------------
# One-time packing (hoisted out of the per-call path): pad + cast + head merge.
# ----------------------------------------------------------------------------
def pack_graph_operands(x, a_hat):
    n, in_dim = x.shape
    n_pad = _pad(n)                                   # lane/tile-aligned nodes
    fin_pad = _pad(in_dim)                            # lane-dense input features
    a_p = jnp.zeros((n_pad, n_pad), jnp.bfloat16)
    a_p = a_p.at[:n, :n].set(a_hat.astype(jnp.bfloat16))
    x_p = jnp.zeros((n_pad, fin_pad), jnp.bfloat16)
    x_p = x_p.at[:n, :in_dim].set(x.astype(jnp.bfloat16))
    return a_p, x_p


def pack_encoder_params(params, n_blocks):
    n_layers = n_blocks + 1
    in_dim, hidden = params["conv1_w"][0].shape
    z_dim = params["mu_w"].shape[1]
    fin_pad = _pad(in_dim)
    f_pad = _pad(hidden)
    h_pad = _pad(2 * z_dim)

    # First-layer weight kept separate (narrow contraction dim).
    w0_p = jnp.zeros((fin_pad, f_pad), jnp.bfloat16)
    w0_p = w0_p.at[:in_dim, :hidden].set(params["conv1_w"][0].astype(jnp.bfloat16))

    n_rest = max(n_layers - 1, 1)                     # avoid a 0-sized operand
    wr_p = jnp.zeros((n_rest, f_pad, f_pad), jnp.bfloat16)
    for i in range(1, n_layers):
        w = params["conv1_w"][i]
        wr_p = wr_p.at[i - 1, :w.shape[0], :w.shape[1]].set(w.astype(jnp.bfloat16))

    b_stack = jnp.zeros((n_layers, 1, f_pad), jnp.float32)
    for i in range(n_layers):
        b = params["conv1_b"][i]
        b_stack = b_stack.at[i, :, :b.shape[1]].set(b)

    # Merge mu / logvar heads: W_head = [W_mu | W_logvar], b_head likewise.
    w_head = jnp.zeros((f_pad, h_pad), jnp.bfloat16)
    w_head = w_head.at[:hidden, :z_dim].set(params["mu_w"].astype(jnp.bfloat16))
    w_head = w_head.at[:hidden, z_dim:2 * z_dim].set(
        params["logvar_w"].astype(jnp.bfloat16))
    b_head = jnp.zeros((1, h_pad), jnp.float32)
    b_head = b_head.at[:, :z_dim].set(params["mu_b"])
    b_head = b_head.at[:, z_dim:2 * z_dim].set(params["logvar_b"])

    return {"w0": w0_p, "wr": wr_p, "b": b_stack,
            "w_head": w_head, "b_head": b_head}


# ----------------------------------------------------------------------------
# Encoder forward: ONE fused Pallas kernel on pre-packed operands.
# ----------------------------------------------------------------------------
@functools.partial(jax.jit, static_argnames=("n_layers", "num_nodes", "z_dim"))
def _encoder_forward_packed(a_p, x_p, w0_p, wr_p, b_stack, w_head, b_head,
                            *, n_layers, num_nodes, z_dim):
    n_pad = a_p.shape[0]
    h_pad = w_head.shape[1]
    operands = (a_p, x_p, w0_p, wr_p, b_stack, w_head, b_head)

    # Explicit VMEM budget: single-buffered operands + f32 output, 2x headroom.
    total_bytes = sum(o.size * o.dtype.itemsize for o in operands)
    total_bytes += n_pad * h_pad * 4
    vmem_limit = int(min(100 * (1 << 20), max(16 * (1 << 20), 2 * total_bytes)))

    vmem = pl.BlockSpec(memory_space=pltpu.MemorySpace.VMEM)
    kernel = functools.partial(encoder_fused_kernel, n_layers=n_layers)
    out = pl.pallas_call(
        kernel,
        out_shape=jax.ShapeDtypeStruct((n_pad, h_pad), jnp.float32),
        in_specs=[vmem] * len(operands),       # no grid -> no double buffering
        out_specs=vmem,
        compiler_params=pltpu.CompilerParams(vmem_limit_bytes=vmem_limit),
    )(*operands)

    mu = out[:num_nodes, :z_dim]
    logvar = out[:num_nodes, z_dim:2 * z_dim]
    return mu, logvar


def encoder_forward(a_p, x_p, packed, *, n_blocks, num_nodes, z_dim):
    return _encoder_forward_packed(
        a_p, x_p, packed["w0"], packed["wr"], packed["b"],
        packed["w_head"], packed["b_head"],
        n_layers=n_blocks + 1, num_nodes=num_nodes, z_dim=z_dim)


def init_params(key, input_dim, hidden_dim, z_dim, n_blocks):
    """Deterministic synthetic parameters (glorot-ish weights, zero bias)."""
    params = {"conv1_w": [], "conv1_b": []}
    dims = [input_dim] + [hidden_dim] * (n_blocks + 1)
    for i in range(n_blocks + 1):
        key, sub = jax.random.split(key)
        fan_in, fan_out = dims[i], dims[i + 1]
        scale = jnp.sqrt(6.0 / (fan_in + fan_out))
        params["conv1_w"].append(
            jax.random.uniform(sub, (fan_in, fan_out), jnp.float32,
                               minval=-scale, maxval=scale))
        params["conv1_b"].append(jnp.zeros((1, fan_out), jnp.float32))
    for name in ("mu", "logvar"):
        key, sub = jax.random.split(key)
        scale = jnp.sqrt(6.0 / (hidden_dim + z_dim))
        params[f"{name}_w"] = jax.random.uniform(
            sub, (hidden_dim, z_dim), jnp.float32, minval=-scale, maxval=scale)
        params[f"{name}_b"] = jnp.zeros((1, z_dim), jnp.float32)
    return params


if __name__ == "__main__":
    # Small shapes consistent with the module's forward.
    num_nodes = 16
    input_dim = 8
    hidden_dim = 32
    z_dim = 16
    n_blocks = 1

    key = jax.random.PRNGKey(0)
    key, kx, ke = jax.random.split(key, 3)

    # Node features [N, input_dim]
    x = jax.random.normal(kx, (num_nodes, input_dim), jnp.float32)

    # Random sparse directed edge_index [2, E] (ring + a few random edges)
    src = jnp.arange(num_nodes, dtype=jnp.int32)
    dst = (src + 1) % num_nodes
    extra_src = jax.random.randint(ke, (8,), 0, num_nodes, jnp.int32)
    extra_dst = (extra_src + 3) % num_nodes
    edge_index = jnp.stack([jnp.concatenate([src, extra_src]),
                            jnp.concatenate([dst, extra_dst])])

    a_hat = normalized_adjacency(edge_index, num_nodes)
    params = init_params(key, input_dim, hidden_dim, z_dim, n_blocks)

    # One-time packing (hoisted out of the forward path).
    a_p, x_p = pack_graph_operands(x, a_hat)
    packed = pack_encoder_params(params, n_blocks)
    jax.block_until_ready((a_p, x_p, packed))

    mu, logvar = encoder_forward(a_p, x_p, packed, n_blocks=n_blocks,
                                 num_nodes=num_nodes, z_dim=z_dim)
    jax.block_until_ready((mu, logvar))

    assert mu.shape == (num_nodes, z_dim) and logvar.shape == (num_nodes, z_dim)

    # --- Reference 1: same math with the same bf16 MXU-input casts (tight). ---
    def ref_gcn_bf16(a, h, w, b, relu):
        xw = jnp.dot(h.astype(jnp.bfloat16), w.astype(jnp.bfloat16),
                     preferred_element_type=jnp.float32)
        o = jnp.dot(a.astype(jnp.bfloat16), xw.astype(jnp.bfloat16),
                    preferred_element_type=jnp.float32) + b
        return jnp.maximum(o, 0.0) if relu else o

    h_ref = x
    for i in range(n_blocks + 1):
        h_ref = ref_gcn_bf16(a_hat, h_ref, params["conv1_w"][i],
                             params["conv1_b"][i], True)
    mu_ref = ref_gcn_bf16(a_hat, h_ref, params["mu_w"], params["mu_b"], False)
    lv_ref = ref_gcn_bf16(a_hat, h_ref, params["logvar_w"], params["logvar_b"],
                          False)
    assert jnp.allclose(mu, mu_ref, atol=1e-3, rtol=1e-3)
    assert jnp.allclose(logvar, lv_ref, atol=1e-3, rtol=1e-3)

    # --- Reference 2: pure f32 math, loose tolerance (bf16 MXU inputs). ---
    def ref_gcn_f32(a, h, w, b, relu):
        o = a @ (h @ w) + b
        return jnp.maximum(o, 0.0) if relu else o

    h32 = x
    for i in range(n_blocks + 1):
        h32 = ref_gcn_f32(a_hat, h32, params["conv1_w"][i],
                          params["conv1_b"][i], True)
    mu32 = ref_gcn_f32(a_hat, h32, params["mu_w"], params["mu_b"], False)
    lv32 = ref_gcn_f32(a_hat, h32, params["logvar_w"], params["logvar_b"], False)
    assert jnp.allclose(mu, mu32, atol=1e-1, rtol=1e-1)
    assert jnp.allclose(logvar, lv32, atol=1e-1, rtol=1e-1)

    # TODO(synk): flow_model (MAFRealNVP/RealNVP) branch and GAT conv_type are
    # not part of this forward() path and are not implemented here.
    print("KERNEL_OK")
</pallas_src>

<mosaic_0001>
module attributes {stable_mosaic.version = 11 : i64} {
  func.func @encoder_fused_kernel(%arg0: memref<128x128xbf16, #tpu.memory_space<vmem>>, %arg1: memref<128x128xbf16, #tpu.memory_space<vmem>>, %arg2: memref<128x128xbf16, #tpu.memory_space<vmem>>, %arg3: memref<1x128x128xbf16, #tpu.memory_space<vmem>>, %arg4: memref<2x1x128xf32, #tpu.memory_space<vmem>>, %arg5: memref<128x128xbf16, #tpu.memory_space<vmem>>, %arg6: memref<1x128xf32, #tpu.memory_space<vmem>>, %arg7: memref<128x128xf32, #tpu.memory_space<vmem>>) attributes {dimension_semantics = [], scalar_prefetch = 0 : i64, scratch_operands = 0 : i64, tpu.core_type = #tpu.core_type<tc>} {
    %c0 = arith.constant 0 : index
    %c0_0 = arith.constant 0 : index
    %0 = vector.load %arg0[%c0, %c0_0] : memref<128x128xbf16, #tpu.memory_space<vmem>>, vector<128x128xbf16>
    %c0_1 = arith.constant 0 : index
    %c0_2 = arith.constant 0 : index
    %1 = vector.load %arg1[%c0_1, %c0_2] : memref<128x128xbf16, #tpu.memory_space<vmem>>, vector<128x128xbf16>
    %c0_3 = arith.constant 0 : index
    %c0_4 = arith.constant 0 : index
    %2 = vector.load %arg2[%c0_3, %c0_4] : memref<128x128xbf16, #tpu.memory_space<vmem>>, vector<128x128xbf16>
    %cst = arith.constant dense<0.000000e+00> : vector<128x128xf32>
    %3 = tpu.matmul %1, %2, %cst {dimension_numbers = #tpu.dot_dimension_numbers<[1], [0], [0], [1], [0, 0, 1, 1], [], []>} : vector<128x128xbf16>, vector<128x128xbf16>, vector<128x128xf32> -> vector<128x128xf32>
    %4 = arith.truncf %3 : vector<128x128xf32> to vector<128x128xbf16>
    %cst_5 = arith.constant dense<0.000000e+00> : vector<128x128xf32>
    %5 = tpu.matmul %0, %4, %cst_5 {dimension_numbers = #tpu.dot_dimension_numbers<[1], [0], [0], [1], [0, 0, 1, 1], [], []>} : vector<128x128xbf16>, vector<128x128xbf16>, vector<128x128xf32> -> vector<128x128xf32>
    %c0_6 = arith.constant 0 : index
    %c0_7 = arith.constant 0 : index
    %c0_8 = arith.constant 0 : index
    %6 = vector.load %arg4[%c0_6, %c0_7, %c0_8] : memref<2x1x128xf32, #tpu.memory_space<vmem>>, vector<1x1x128xf32>
    %7 = vector.shape_cast %6 : vector<1x1x128xf32> to vector<1x128xf32>
    %8 = vector.broadcast %7 : vector<1x128xf32> to vector<128x128xf32>
    %9 = arith.addf %5, %8 : vector<128x128xf32>
    %cst_9 = arith.constant 0.000000e+00 : f32
    %10 = vector.broadcast %cst_9 : f32 to vector<128x128xf32>
    %11 = arith.maximumf %9, %10 : vector<128x128xf32>
    %12 = arith.truncf %11 : vector<128x128xf32> to vector<128x128xbf16>
    %c0_10 = arith.constant 0 : index
    %c0_11 = arith.constant 0 : index
    %c0_12 = arith.constant 0 : index
    %13 = vector.load %arg3[%c0_10, %c0_11, %c0_12] : memref<1x128x128xbf16, #tpu.memory_space<vmem>>, vector<1x128x128xbf16>
    %14 = vector.shape_cast %13 : vector<1x128x128xbf16> to vector<128x128xbf16>
    %cst_13 = arith.constant dense<0.000000e+00> : vector<128x128xf32>
    %15 = tpu.matmul %12, %14, %cst_13 {dimension_numbers = #tpu.dot_dimension_numbers<[1], [0], [0], [1], [0, 0, 1, 1], [], []>} : vector<128x128xbf16>, vector<128x128xbf16>, vector<128x128xf32> -> vector<128x128xf32>
    %16 = arith.truncf %15 : vector<128x128xf32> to vector<128x128xbf16>
    %cst_14 = arith.constant dense<0.000000e+00> : vector<128x128xf32>
    %17 = tpu.matmul %0, %16, %cst_14 {dimension_numbers = #tpu.dot_dimension_numbers<[1], [0], [0], [1], [0, 0, 1, 1], [], []>} : vector<128x128xbf16>, vector<128x128xbf16>, vector<128x128xf32> -> vector<128x128xf32>
    %c1 = arith.constant 1 : index
    %c0_15 = arith.constant 0 : index
    %c0_16 = arith.constant 0 : index
    %18 = vector.load %arg4[%c1, %c0_15, %c0_16] : memref<2x1x128xf32, #tpu.memory_space<vmem>>, vector<1x1x128xf32>
    %19 = vector.shape_cast %18 : vector<1x1x128xf32> to vector<1x128xf32>
    %20 = vector.broadcast %19 : vector<1x128xf32> to vector<128x128xf32>
    %21 = arith.addf %17, %20 : vector<128x128xf32>
    %cst_17 = arith.constant 0.000000e+00 : f32
    %22 = vector.broadcast %cst_17 : f32 to vector<128x128xf32>
    %23 = arith.maximumf %21, %22 : vector<128x128xf32>
    %24 = arith.truncf %23 : vector<128x128xf32> to vector<128x128xbf16>
    %c0_18 = arith.constant 0 : index
    %c0_19 = arith.constant 0 : index
    %25 = vector.load %arg5[%c0_18, %c0_19] : memref<128x128xbf16, #tpu.memory_space<vmem>>, vector<128x128xbf16>
    %cst_20 = arith.constant dense<0.000000e+00> : vector<128x128xf32>
    %26 = tpu.matmul %24, %25, %cst_20 {dimension_numbers = #tpu.dot_dimension_numbers<[1], [0], [0], [1], [0, 0, 1, 1], [], []>} : vector<128x128xbf16>, vector<128x128xbf16>, vector<128x128xf32> -> vector<128x128xf32>
    %27 = arith.truncf %26 : vector<128x128xf32> to vector<128x128xbf16>
    %cst_21 = arith.constant dense<0.000000e+00> : vector<128x128xf32>
    %28 = tpu.matmul %0, %27, %cst_21 {dimension_numbers = #tpu.dot_dimension_numbers<[1], [0], [0], [1], [0, 0, 1, 1], [], []>} : vector<128x128xbf16>, vector<128x128xbf16>, vector<128x128xf32> -> vector<128x128xf32>
    %c0_22 = arith.constant 0 : index
    %c0_23 = arith.constant 0 : index
    %29 = vector.load %arg6[%c0_22, %c0_23] : memref<1x128xf32, #tpu.memory_space<vmem>>, vector<1x128xf32>
    %30 = vector.broadcast %29 : vector<1x128xf32> to vector<128x128xf32>
    %31 = arith.addf %28, %30 : vector<128x128xf32>
    %c0_24 = arith.constant 0 : index
    %c0_25 = arith.constant 0 : index
    %32 = vector.load %arg7[%c0_24, %c0_25] : memref<128x128xf32, #tpu.memory_space<vmem>>, vector<128x128xf32>
    tpu.vector_store %arg7[%c0_24, %c0_25], %31 {strides = array<i32>} : memref<128x128xf32, #tpu.memory_space<vmem>>, vector<128x128xf32>,
    return
  }
}

</mosaic_0001>

<bundles_post_ra>
// kernel: _encoder_forward_packed.1
= control target key start
LH: loop header
LB: loop body
LE: loop exit
PB: predicated region body
PF: predicated region fallthrough
CT: control target
= control target key end

     0   :  { %12 = vsyncpa [#allocation3], 0  ;;  %s1842_s0 = inlined_call_operand.hbm [shape: bf16[128,128], index: 0, kind: input, shape index: {}]   ;;  %s1843_s1 = inlined_call_operand.hbm [shape: bf16[128,128], index: 1, kind: input, shape index: {}]   ;;  %s1844_s2 = inlined_call_operand.hbm [shape: bf16[128,128], index: 2, kind: input, shape index: {}]   ;;  %s1845_s3 = inlined_call_operand.hbm [shape: bf16[1,128,128], index: 3, kind: input, shape index: {}]   ;;  %s1846_s4 = inlined_call_operand.vmem [shape: f32[2,1,128], index: 4, kind: input, shape index: {}]   ;;  %s1847_s5 = inlined_call_operand.hbm [shape: bf16[128,128], index: 5, kind: input, shape index: {}]   ;;  %s1848_s6 = inlined_call_operand.vmem [shape: f32[1,128], index: 6, kind: input, shape index: {}]   ;;  %s1849_s7 = inlined_call_operand.vmem [shape: f32[128,128], index: 7, kind: output, shape index: {}]  }
   0x1   :  { %13 = vsyncpa [#allocation5], 0 }
   0x2   :  { %14 = vsyncpa [#allocation8], 0  ;;  %s1609_s24 = smov [#allocation4]   ;;  %s1610_s26 = smov [#allocation7]  }
   0x3   :  { %s32_s25 = sshll.u32 %s1609_s24, 4  ;;  %s56_s27 = sshll.u32 %s1610_s26, 4  ;;  %s33_s25 = int_to_ptr.vmem [resolvable:$true] %s32_s25  ;;  %s1656_s27 = int_to_ptr.vmem [resolvable:$true] %s56_s27 }
   0x4   :  { %s1493_s30 = scalar_lea.hbm %s1843_s1, 1024 }
   0x5   :  { %p1494_p0 = scmp.ne.s32.totalorder %s1843_s1, %s1493_s30  ;;  %p1497_p1 = scmp.lt.u32.totalorder %s1493_s30, %s1843_s1 }
   0x7   :  { %p1499_p2 = pnand %p1497_p1, %p1494_p0 }
   0x9   :  { %1502 = shalt.err (!%p1499_p2)
}
   0xa   :  { %s1503_s12 = scalar_lea.vmem %s33_s25, 1024  ;;  %p1508_p4 = scmp.lt.s32.totalorder %s33_s25, %s33_s25 }
   0xb   :  { %p1504_p3 = scmp.ne.s32.totalorder %s33_s25, %s1503_s12  ;;  %p1509_p5 = scmp.lt.s32.totalorder %s1503_s12, %s1503_s12 }
   0xd   :  { %p1510_p6 = por %p1509_p5, %p1508_p4 }
   0xf   :  { %p1511_p7 = pnand %p1510_p6, %p1504_p3 }
  0x11   :  { %1514 = shalt.err (!%p1511_p7)
}
  0x12   :  { %s1611_s13 = smov 64   ;;  %s1612_s14 = smov 4  }
  0x13   :  { %38 = dma.hbm_to_vmem [thread:$0]  %s1843_s1, 1024, %s33_s25, [#allocation5], %s1611_s13, %s1611_s13, %s1612_s14  }
  0x14   :  { %s1515_s19 = scalar_lea.hbm %s1845_s3, 1024 }
  0x15   :  { %p1516_p8 = scmp.ne.s32.totalorder %s1845_s3, %s1515_s19  ;;  %p1519_p9 = scmp.lt.u32.totalorder %s1515_s19, %s1845_s3 }
  0x17   :  { %p1521_p10 = pnand %p1519_p9, %p1516_p8 }
  0x19   :  { %1524 = shalt.err (!%p1521_p10)
}
  0x1a   :  { %s1525_s24 = scalar_lea.vmem %s1656_s27, 1024  ;;  %p1530_p12 = scmp.lt.s32.totalorder %s1656_s27, %s1656_s27 }
  0x1b   :  { %p1526_p11 = scmp.ne.s32.totalorder %s1656_s27, %s1525_s24  ;;  %p1531_p13 = scmp.lt.s32.totalorder %s1525_s24, %s1525_s24 }
  0x1d   :  { %p1532_p0 = por %p1531_p13, %p1530_p12 }
  0x1f   :  { %p1533_p1 = pnand %p1532_p0, %p1526_p11 }
  0x21   :  { %1536 = shalt.err (!%p1533_p1)
}
  0x22   :  { %62 = dma.hbm_to_vmem [thread:$0]  %s1845_s3, 1024, %s1656_s27, [#allocation8], %s1611_s13, %s1611_s13, %s1612_s14  }
  0x23   :  { %s1613_s26 = smov [#allocation2]   ;;  %s1614_s29 = smov [#allocation6]  }
  0x24   :  { %s20_s28 = sshll.u32 %s1613_s26, 4  ;;  %s44_s30 = sshll.u32 %s1614_s29, 4  ;;  %s21_s28 = int_to_ptr.vmem [resolvable:$true] %s20_s28  ;;  %s1693_s30 = int_to_ptr.vmem [resolvable:$true] %s44_s30 }
  0x25   :  { %s1537_s10 = scalar_lea.hbm %s1842_s0, 1024 }
  0x26   :  { %p1538_p2 = scmp.ne.s32.totalorder %s1842_s0, %s1537_s10  ;;  %p1541_p3 = scmp.lt.u32.totalorder %s1537_s10, %s1842_s0 }
  0x28   :  { %p1543_p4 = pnand %p1541_p3, %p1538_p2 }
  0x2a   :  { %1546 = shalt.err (!%p1543_p4)
}
  0x2b   :  { %s1547_s3 = scalar_lea.vmem %s21_s28, 1024  ;;  %p1552_p6 = scmp.lt.s32.totalorder %s21_s28, %s21_s28 }
  0x2c   :  { %p1548_p5 = scmp.ne.s32.totalorder %s21_s28, %s1547_s3  ;;  %p1553_p7 = scmp.lt.s32.totalorder %s1547_s3, %s1547_s3 }
  0x2e   :  { %p1554_p8 = por %p1553_p7, %p1552_p6 }
  0x30   :  { %p1555_p9 = pnand %p1554_p8, %p1548_p5 }
  0x32   :  { %1558 = shalt.err (!%p1555_p9)
}
  0x33   :  { %26 = dma.hbm_to_vmem [thread:$0]  %s1842_s0, 1024, %s21_s28, [#allocation3], %s1611_s13, %s1611_s13, %s1612_s14  }
  0x34   :  { %s1559_s20 = scalar_lea.hbm %s1844_s2, 1024 }
  0x35   :  { %p1560_p10 = scmp.ne.s32.totalorder %s1844_s2, %s1559_s20  ;;  %p1563_p11 = scmp.lt.u32.totalorder %s1559_s20, %s1844_s2 }
  0x37   :  { %p1565_p12 = pnand %p1563_p11, %p1560_p10 }
  0x39   :  { %1568 = shalt.err (!%p1565_p12)
}
  0x3a   :  { %s1569_s1 = scalar_lea.vmem %s1693_s30, 1024  ;;  %p1574_p0 = scmp.lt.s32.totalorder %s1693_s30, %s1693_s30 }
  0x3b   :  { %p1570_p13 = scmp.ne.s32.totalorder %s1693_s30, %s1569_s1  ;;  %p1575_p1 = scmp.lt.s32.totalorder %s1569_s1, %s1569_s1 }
  0x3d   :  { %p1576_p2 = por %p1575_p1, %p1574_p0 }
  0x3f   :  { %p1577_p3 = pnand %p1576_p2, %p1570_p13 }
  0x41   :  { %1580 = shalt.err (!%p1577_p3)
}
  0x42   :  { %50 = dma.hbm_to_vmem [thread:$0]  %s1844_s2, 1024, %s1693_s30, [#allocation5], %s1611_s13, %s1611_s13, %s1612_s14  }
  0x43   :  { %s1615_s26 = smov [#allocation9]   ;;  %s1581_s9 = scalar_lea.hbm %s1847_s5, 1024 }
  0x44   :  { %s70_s28 = sshll.u32 %s1615_s26, 4  ;;  %p1582_p4 = scmp.ne.s32.totalorder %s1847_s5, %s1581_s9  ;;  %s71_s28 = int_to_ptr.vmem [resolvable:$true] %s70_s28 }
  0x45   :  { %p1585_p5 = scmp.lt.u32.totalorder %s1581_s9, %s1847_s5 }
  0x47   :  { %p1587_p6 = pnand %p1585_p5, %p1582_p4 }
  0x49   :  { %1590 = shalt.err (!%p1587_p6)
}
  0x4a   :  { %s1591_s16 = scalar_lea.vmem %s71_s28, 1024  ;;  %p1596_p8 = scmp.lt.s32.totalorder %s71_s28, %s71_s28 }
  0x4b   :  { %p1592_p7 = scmp.ne.s32.totalorder %s71_s28, %s1591_s16  ;;  %p1597_p9 = scmp.lt.s32.totalorder %s1591_s16, %s1591_s16 }
  0x4d   :  { %p1598_p10 = por %p1597_p9, %p1596_p8 }
  0x4f   :  { %p1599_p11 = pnand %p1598_p10, %p1592_p7 }
  0x51   :  { %1602 = shalt.err (!%p1599_p11)
}
  0x52   :  { %76 = dma.hbm_to_vmem [thread:$0]  %s1847_s5, 1024, %s71_s28, [#allocation8], %s1611_s13, %s1611_s13, %s1612_s14  }
  0x53   :  { %1603 = dma.done.wait [#allocation3], 1024  }
  0x54   :  { %1604 = vsyncadd [#allocation3], 4294966272 }
  0x55   :  { %1605 = dma.done.wait [#allocation5], 2048  }
  0x56   :  { %1606 = vsyncadd [#allocation5], 4294965248 }
  0x57   :  { %1607 = dma.done.wait [#allocation8], 2048  }
  0x58   :  { %1608 = vsyncadd [#allocation8], 4294965248  ;;  %v1453_v0 = vld [vmem:[#allocation6] sm:$0xff]   ;;  %v1454_v1 = vld [vmem:[#allocation6 + $0x8] sm:$0xff]  }
  0x59   :  { %1254 = vmatprep.subr.bf16.mxu0 %v1453_v0  ;;  %v1455_v2 = vld [vmem:[#allocation6 + $0x10] sm:$0xff]   ;;  %v1456_v3 = vld [vmem:[#allocation6 + $0x18] sm:$0xff]   ;;  %v1461_v4 = vld [vmem:[#allocation4] sm:$0xff]  }
  0x5a   :  { %1255 = vmatpush3.bf16.msra.mxu0 %v1453_v0  ;;  %1270 = vmatprep.mubr.bf16.mxu0 %v1461_v4  ;;  %v1457_v5 = vld [vmem:[#allocation6 + $0x20] sm:$0xff]   ;;  %v1458_v6 = vld [vmem:[#allocation6 + $0x28] sm:$0xff]   ;;  %v1459_v7 = vld [vmem:[#allocation6 + $0x30] sm:$0xff]  }
  0x5b   :  { %1256 = vmatprep.subr.bf16.mxu0 %v1454_v1  ;;  %v1460_v8 = vld [vmem:[#allocation6 + $0x38] sm:$0xff]   ;;  %v1462_v9 = vld [vmem:[#allocation4 + $0x8] sm:$0xff]   ;;  %v1463_v10 = vld [vmem:[#allocation4 + $0x10] sm:$0xff]  }
  0x5c   :  { %v1464_v11 = vld [vmem:[#allocation4 + $0x18] sm:$0xff]   ;;  %v1465_v12 = vld [vmem:[#allocation4 + $0x20] sm:$0xff]   ;;  %v1466_v13 = vld [vmem:[#allocation4 + $0x28] sm:$0xff]  }
  0x5d   :  { %v1467_v14 = vld [vmem:[#allocation4 + $0x30] sm:$0xff]   ;;  %v1468_v15 = vld [vmem:[#allocation4 + $0x38] sm:$0xff]   ;;  %v1745_v16 = vld [vmem:[#allocation2] sm:$0xff]  }
  0x5e   :  { %1257 = vmatpush3.bf16.msra.mxu0 %v1454_v1  ;;  %1302 = vmatprep.mubr.bf16.mxu1 %v1745_v16  ;;  %v1477_v17 = vld [vmem:[#allocation7] sm:$0xff]   ;;  %v1478_v18 = vld [vmem:[#allocation7 + $0x8] sm:$0xff]   ;;  %v1479_v19 = vld [vmem:[#allocation7 + $0x10] sm:$0xff]  }
  0x5f   :  { %1258 = vmatprep.subr.bf16.mxu0 %v1455_v2  ;;  %v1480_v20 = vld [vmem:[#allocation7 + $0x18] sm:$0xff]   ;;  %v1481_v21 = vld [vmem:[#allocation7 + $0x20] sm:$0xff]   ;;  %v1482_v22 = vld [vmem:[#allocation7 + $0x28] sm:$0xff]  }
  0x60   :  { %v1748_v47 = vld [vmem:[#allocation2 + $0x8] sm:$0xff]   ;;  %v1750_v48 = vld [vmem:[#allocation2 + $0x10] sm:$0xff]   ;;  %v1754_v49 = vld [vmem:[#allocation2 + $0x18] sm:$0xff]  }
  0x61   :  { %v1756_v50 = vld [vmem:[#allocation2 + $0x20] sm:$0xff]   ;;  %v1760_v51 = vld [vmem:[#allocation2 + $0x28] sm:$0xff]   ;;  %v1762_v52 = vld [vmem:[#allocation2 + $0x30] sm:$0xff]  }
  0x62   :  { %1259 = vmatpush3.bf16.msra.mxu0 %v1455_v2  ;;  %v1766_v53 = vld [vmem:[#allocation2 + $0x38] sm:$0xff]   ;;  %v1483_v54 = vld [vmem:[#allocation7 + $0x30] sm:$0xff]   ;;  %v1130_v56 = vld [vmem:[%s1846_s4] ss:$0 sm:$0xff] }
  0x63   :  { %1260 = vmatprep.subr.bf16.mxu0 %v1456_v3  ;;  %v1484_v55 = vld [vmem:[#allocation7 + $0x38] sm:$0xff]  }
  0x66   :  { %1261 = vmatpush3.bf16.msra.mxu0 %v1456_v3 }
  0x67   :  { %1262 = vmatprep.subr.bf16.mxu0 %v1457_v5 }
  0x6a   :  { %1263 = vmatpush3.bf16.msra.mxu0 %v1457_v5 }
  0x6b   :  { %1264 = vmatprep.subr.bf16.mxu0 %v1458_v6 }
  0x6e   :  { %1265 = vmatpush3.bf16.msra.mxu0 %v1458_v6 }
  0x6f   :  { %1266 = vmatprep.subr.bf16.mxu0 %v1459_v7 }
  0x72   :  { %1267 = vmatpush3.bf16.msra.mxu0 %v1459_v7 }
  0x73   :  { %1268 = vmatprep.subr.bf16.mxu0 %v1460_v8 }
  0x76   :  { %1269 = vmatpush3.bf16.msra.mxu0 %v1460_v8 }
  0x77   :  { %1318 = vmatprep.subr.bf16.mxu0 %v1477_v17 }
  0x79   :  { %1271 = vmatmul.mubr.bf16.vlgmr.msra.gmra.mrb[0].mxu0 %v1462_v9 }
  0x7a   :  { %1274 = vmatprep.mubr.bf16.mxu0 %v1463_v10  ;;  %1319 = vmatpush3.bf16.msra.mxu0 %v1477_v17 }
  0x7b   :  { %1320 = vmatprep.subr.bf16.mxu0 %v1478_v18 }
  0x7e   :  { %1321 = vmatpush3.bf16.msra.mxu0 %v1478_v18 }
  0x7f   :  { %1322 = vmatprep.subr.bf16.mxu0 %v1479_v19 }
  0x81   :  { %1275 = vmatmul.mubr.bf16.gmra.mrb[4].mxu0 %v1464_v11 }
  0x82   :  { %1278 = vmatprep.mubr.bf16.mxu0 %v1465_v12  ;;  %1323 = vmatpush3.bf16.msra.mxu0 %v1479_v19 }
  0x83   :  { %1324 = vmatprep.subr.bf16.mxu0 %v1480_v20 }
  0x86   :  { %1325 = vmatpush3.bf16.msra.mxu0 %v1480_v20 }
  0x87   :  { %1326 = vmatprep.subr.bf16.mxu0 %v1481_v21 }
  0x89   :  { %1279 = vmatmul.mubr.bf16.gmra.mrb[8].mxu0 %v1466_v13 }
  0x8a   :  { %1282 = vmatprep.mubr.bf16.mxu0 %v1467_v14  ;;  %1327 = vmatpush3.bf16.msra.mxu0 %v1481_v21 }
  0x8b   :  { %1328 = vmatprep.subr.bf16.mxu0 %v1482_v22 }
  0x8e   :  { %1329 = vmatpush3.bf16.msra.mxu0 %v1482_v22 }
  0x8f   :  { %1330 = vmatprep.subr.bf16.mxu0 %v1483_v54 }
  0x91   :  { %1283 = vmatmul.mubr.bf16.gmra.mrb[12].mxu0 %v1468_v15 }
  0x92   :  { %1331 = vmatpush3.bf16.msra.mxu0 %v1483_v54 }
  0x93   :  { %1332 = vmatprep.subr.bf16.mxu0 %v1484_v55 }
  0x96   :  { %1333 = vmatpush3.bf16.msra.mxu0 %v1484_v55 }
 0x14c   :  { %v1272_v23 = vpop.f32.mrb[0].mxu0 }
 0x14d   :  { %v273_v24 = vpop.f32.mrb[1].mxu0 }
 0x14e   :  { %v1273_v25 = vpop.f32.mrb[2].mxu0 }
 0x14f   :  { %v337_v26 = vpack.c.bf16 %v1273_v25, %v1272_v23  ;;  %v276_v27 = vpop.f32.mrb[3].mxu0 }
 0x150   :  { %v336_v28 = vpack.c.bf16 %v276_v27, %v273_v24 }
 0x152   :  { %1286 = vmatprep.subr.bf16.mxu1 %v336_v28 }
 0x153   :  { %1287 = vmatpush3.bf16.msra.mxu1 %v336_v28 }
 0x154   :  { %v1276_v29 = vpop.f32.mrb[4].mxu0  ;;  %1288 = vmatprep.subr.bf16.mxu1 %v337_v26 }
 0x155   :  { %v289_v30 = vpop.f32.mrb[5].mxu0 }
 0x156   :  { %v1277_v31 = vpop.f32.mrb[6].mxu0 }
 0x157   :  { %v339_v32 = vpack.c.bf16 %v1277_v31, %v1276_v29  ;;  %v292_v33 = vpop.f32.mrb[7].mxu0  ;;  %1289 = vmatpush3.bf16.msra.mxu1 %v337_v26 }
 0x158   :  { %v338_v34 = vpack.c.bf16 %v292_v33, %v289_v30 }
 0x15a   :  { %1290 = vmatprep.subr.bf16.mxu1 %v338_v34 }
 0x15b   :  { %1291 = vmatpush3.bf16.msra.mxu1 %v338_v34 }
 0x15c   :  { %v1280_v35 = vpop.f32.mrb[8].mxu0  ;;  %1292 = vmatprep.subr.bf16.mxu1 %v339_v32 }
 0x15d   :  { %v305_v36 = vpop.f32.mrb[9].mxu0 }
 0x15e   :  { %v1281_v37 = vpop.f32.mrb[10].mxu0 }
 0x15f   :  { %v341_v38 = vpack.c.bf16 %v1281_v37, %v1280_v35  ;;  %v308_v39 = vpop.f32.mrb[11].mxu0  ;;  %1293 = vmatpush3.bf16.msra.mxu1 %v339_v32 }
 0x160   :  { %v340_v40 = vpack.c.bf16 %v308_v39, %v305_v36 }
 0x162   :  { %1294 = vmatprep.subr.bf16.mxu1 %v340_v40 }
 0x163   :  { %1295 = vmatpush3.bf16.msra.mxu1 %v340_v40 }
 0x164   :  { %v1284_v41 = vpop.f32.mrb[12].mxu0  ;;  %1296 = vmatprep.subr.bf16.mxu1 %v341_v38 }
 0x165   :  { %v321_v42 = vpop.f32.mrb[13].mxu0 }
 0x166   :  { %v1285_v43 = vpop.f32.mrb[14].mxu0 }
 0x167   :  { %v343_v44 = vpack.c.bf16 %v1285_v43, %v1284_v41  ;;  %v324_v45 = vpop.f32.mrb[15].mxu0  ;;  %1297 = vmatpush3.bf16.msra.mxu1 %v341_v38 }
 0x168   :  { %v342_v46 = vpack.c.bf16 %v324_v45, %v321_v42 }
 0x16a   :  { %1298 = vmatprep.subr.bf16.mxu1 %v342_v46 }
 0x16b   :  { %1299 = vmatpush3.bf16.msra.mxu1 %v342_v46 }
 0x16c   :  { %1300 = vmatprep.subr.bf16.mxu1 %v343_v44 }
 0x16f   :  { %1301 = vmatpush3.bf16.msra.mxu1 %v343_v44 }
 0x172   :  { %1303 = vmatmul.mubr.bf16.vlgmr.msra.gmra.mrb[0].mxu1 %v1748_v47 }
 0x173   :  { %1306 = vmatprep.mubr.bf16.mxu1 %v1750_v48 }
 0x17a   :  { %1307 = vmatmul.mubr.bf16.gmra.mrb[4].mxu1 %v1754_v49 }
 0x17b   :  { %1310 = vmatprep.mubr.bf16.mxu1 %v1756_v50 }
 0x182   :  { %1311 = vmatmul.mubr.bf16.gmra.mrb[8].mxu1 %v1760_v51 }
 0x183   :  { %1314 = vmatprep.mubr.bf16.mxu1 %v1762_v52 }
 0x18a   :  { %1315 = vmatmul.mubr.bf16.gmra.mrb[12].mxu1 %v1766_v53 }
 0x18b   :  { %1366 = vmatprep.mubr.bf16.mxu1 %v1745_v16 }
 0x245   :  { %v1304_v57 = vpop.f32.mrb[0].mxu1 }
 0x246   :  { %v442_v58 = vadd.f32 %v1304_v57, %v1130_v56  ;;  %v433_v59 = vpop.f32.mrb[1].mxu1 }
 0x247   :  { %v434_v60 = vadd.f32 %v1130_v56, %v433_v59  ;;  %v1305_v61 = vpop.f32.mrb[2].mxu1  ;;  %v1486_v59 = vld [vmem:[#allocation9 + $0x8] sm:$0xff]  }
 0x248   :  { %v445_v62 = vadd.f32 %v1305_v61, %v1130_v56  ;;  %v436_v63 = vpop.f32.mrb[3].mxu1  ;;  %v498_v1 = vmax.f32 %v442_v58, 0.0  ;;  %v1485_v58 = vld [vmem:[#allocation9] sm:$0xff]   ;;  %v1488_v61 = vld [vmem:[#allocation9 + $0x18] sm:$0xff]  }
 0x249   :  { %v437_v0 = vadd.f32 %v1130_v56, %v436_v63  ;;  %v496_v3 = vmax.f32 %v434_v60, 0.0  ;;  %1382 = vmatprep.subr.bf16.mxu0 %v1485_v58  ;;  %v1487_v60 = vld [vmem:[#allocation9 + $0x10] sm:$0xff]  }
 0x24a   :  { %v499_v2 = vmax.f32 %v445_v62, 0.0  ;;  %v1490_v62 = vld [vmem:[#allocation9 + $0x28] sm:$0xff]  }
 0x24b   :  { %v497_v4 = vmax.f32 %v437_v0, 0.0 }
 0x24c   :  { %v513_v5 = vpack.c.bf16 %v499_v2, %v498_v1 }
 0x24d   :  { %v512_v6 = vpack.c.bf16 %v497_v4, %v496_v3  ;;  %v1308_v7 = vpop.f32.mrb[4].mxu1 }
 0x24e   :  { %v458_v8 = vadd.f32 %v1308_v7, %v1130_v56  ;;  %v449_v9 = vpop.f32.mrb[5].mxu1 }
 0x24f   :  { %v450_v10 = vadd.f32 %v1130_v56, %v449_v9  ;;  %v1309_v11 = vpop.f32.mrb[6].mxu1  ;;  %1334 = vmatprep.mubr.bf16.mxu0 %v512_v6 }
 0x250   :  { %v461_v12 = vadd.f32 %v1309_v11, %v1130_v56  ;;  %v452_v13 = vpop.f32.mrb[7].mxu1  ;;  %1335 = vmatmul.mubr.bf16.vlgmr.msra.gmra.mrb[16].mxu0 %v513_v5  ;;  %v502_v15 = vmax.f32 %v458_v8, 0.0 }
 0x251   :  { %v453_v14 = vadd.f32 %v1130_v56, %v452_v13  ;;  %v500_v18 = vmax.f32 %v450_v10, 0.0  ;;  %1383 = vmatpush3.bf16.msra.mxu0 %v1485_v58 }
 0x252   :  { %v503_v17 = vmax.f32 %v461_v12, 0.0  ;;  %1384 = vmatprep.subr.bf16.mxu0 %v1486_v59 }
 0x253   :  { %v501_v19 = vmax.f32 %v453_v14, 0.0 }
 0x254   :  { %v515_v20 = vpack.c.bf16 %v503_v17, %v502_v15 }
 0x255   :  { %v514_v21 = vpack.c.bf16 %v501_v19, %v500_v18  ;;  %v1312_v22 = vpop.f32.mrb[8].mxu1  ;;  %1385 = vmatpush3.bf16.msra.mxu0 %v1486_v59 }
 0x256   :  { %v474_v23 = vadd.f32 %v1312_v22, %v1130_v56  ;;  %v465_v24 = vpop.f32.mrb[9].mxu1  ;;  %1386 = vmatprep.subr.bf16.mxu0 %v1487_v60 }
 0x257   :  { %v466_v25 = vadd.f32 %v1130_v56, %v465_v24  ;;  %v1313_v26 = vpop.f32.mrb[10].mxu1  ;;  %1338 = vmatprep.mubr.bf16.mxu0 %v514_v21  ;;  %v1491_v24 = vld [vmem:[#allocation9 + $0x30] sm:$0xff]  }
 0x258   :  { %v477_v27 = vadd.f32 %v1313_v26, %v1130_v56  ;;  %v468_v28 = vpop.f32.mrb[11].mxu1  ;;  %1339 = vmatmul.mubr.bf16.gmra.mrb[20].mxu0 %v515_v20  ;;  %v506_v30 = vmax.f32 %v474_v23, 0.0  ;;  %v1148_v26 = vld [vmem:[%s1846_s4 + $0x1] ss:$0 sm:$0xff] }
 0x259   :  { %v469_v29 = vadd.f32 %v1130_v56, %v468_v28  ;;  %v504_v32 = vmax.f32 %v466_v25, 0.0  ;;  %1387 = vmatpush3.bf16.msra.mxu0 %v1487_v60  ;;  %v1492_v25 = vld [vmem:[#allocation9 + $0x38] sm:$0xff]  }
 0x25a   :  { %v507_v31 = vmax.f32 %v477_v27, 0.0  ;;  %1388 = vmatprep.subr.bf16.mxu0 %v1488_v61 }
 0x25b   :  { %v505_v33 = vmax.f32 %v469_v29, 0.0 }
 0x25c   :  { %v517_v34 = vpack.c.bf16 %v507_v31, %v506_v30 }
 0x25d   :  { %v516_v35 = vpack.c.bf16 %v505_v33, %v504_v32  ;;  %v1316_v36 = vpop.f32.mrb[12].mxu1  ;;  %1389 = vmatpush3.bf16.msra.mxu0 %v1488_v61 }
 0x25e   :  { %v490_v37 = vadd.f32 %v1316_v36, %v1130_v56  ;;  %v481_v38 = vpop.f32.mrb[13].mxu1 }
 0x25f   :  { %v482_v39 = vadd.f32 %v1130_v56, %v481_v38  ;;  %v1317_v40 = vpop.f32.mrb[14].mxu1  ;;  %1342 = vmatprep.mubr.bf16.mxu0 %v516_v35 }
 0x260   :  { %v493_v41 = vadd.f32 %v1317_v40, %v1130_v56  ;;  %v484_v42 = vpop.f32.mrb[15].mxu1  ;;  %1343 = vmatmul.mubr.bf16.gmra.mrb[24].mxu0 %v517_v34  ;;  %v510_v44 = vmax.f32 %v490_v37, 0.0 }
 0x261   :  { %v485_v43 = vadd.f32 %v1130_v56, %v484_v42  ;;  %v508_v46 = vmax.f32 %v482_v39, 0.0  ;;  %v1489_v56 = vld [vmem:[#allocation9 + $0x20] sm:$0xff]  }
 0x262   :  { %v511_v45 = vmax.f32 %v493_v41, 0.0  ;;  %1390 = vmatprep.subr.bf16.mxu0 %v1489_v56 }
 0x263   :  { %v509_v54 = vmax.f32 %v485_v43, 0.0  ;;  %1391 = vmatpush3.bf16.msra.mxu0 %v1489_v56 }
 0x264   :  { %v519_v55 = vpack.c.bf16 %v511_v45, %v510_v44  ;;  %1392 = vmatprep.subr.bf16.mxu0 %v1490_v62 }
 0x265   :  { %v518_v57 = vpack.c.bf16 %v509_v54, %v508_v46 }
 0x267   :  { %1346 = vmatprep.mubr.bf16.mxu0 %v518_v57  ;;  %1393 = vmatpush3.bf16.msra.mxu0 %v1490_v62 }
 0x268   :  { %1347 = vmatmul.mubr.bf16.gmra.mrb[28].mxu0 %v519_v55  ;;  %1394 = vmatprep.subr.bf16.mxu0 %v1491_v24 }
 0x26b   :  { %1395 = vmatpush3.bf16.msra.mxu0 %v1491_v24 }
 0x26c   :  { %1396 = vmatprep.subr.bf16.mxu0 %v1492_v25 }
 0x26f   :  { %1397 = vmatpush3.bf16.msra.mxu0 %v1492_v25 }
 0x323   :  { %v1336_v63 = vpop.f32.mrb[16].mxu0 }
 0x324   :  { %v618_v0 = vpop.f32.mrb[17].mxu0 }
 0x325   :  { %v1337_v1 = vpop.f32.mrb[18].mxu0 }
 0x326   :  { %v682_v2 = vpack.c.bf16 %v1337_v1, %v1336_v63  ;;  %v621_v3 = vpop.f32.mrb[19].mxu0 }
 0x327   :  { %v681_v4 = vpack.c.bf16 %v621_v3, %v618_v0 }
 0x329   :  { %1350 = vmatprep.subr.bf16.mxu1 %v681_v4 }
 0x32a   :  { %1351 = vmatpush3.bf16.msra.mxu1 %v681_v4 }
 0x32b   :  { %v1340_v5 = vpop.f32.mrb[20].mxu0  ;;  %1352 = vmatprep.subr.bf16.mxu1 %v682_v2 }
 0x32c   :  { %v634_v6 = vpop.f32.mrb[21].mxu0 }
 0x32d   :  { %v1341_v7 = vpop.f32.mrb[22].mxu0 }
 0x32e   :  { %v684_v8 = vpack.c.bf16 %v1341_v7, %v1340_v5  ;;  %v637_v9 = vpop.f32.mrb[23].mxu0  ;;  %1353 = vmatpush3.bf16.msra.mxu1 %v682_v2 }
 0x32f   :  { %v683_v10 = vpack.c.bf16 %v637_v9, %v634_v6 }
 0x331   :  { %1354 = vmatprep.subr.bf16.mxu1 %v683_v10 }
 0x332   :  { %1355 = vmatpush3.bf16.msra.mxu1 %v683_v10 }
 0x333   :  { %v1344_v11 = vpop.f32.mrb[24].mxu0  ;;  %1356 = vmatprep.subr.bf16.mxu1 %v684_v8 }
 0x334   :  { %v650_v12 = vpop.f32.mrb[25].mxu0 }
 0x335   :  { %v1345_v13 = vpop.f32.mrb[26].mxu0 }
 0x336   :  { %v686_v14 = vpack.c.bf16 %v1345_v13, %v1344_v11  ;;  %v653_v15 = vpop.f32.mrb[27].mxu0  ;;  %1357 = vmatpush3.bf16.msra.mxu1 %v684_v8 }
 0x337   :  { %v685_v17 = vpack.c.bf16 %v653_v15, %v650_v12 }
 0x339   :  { %1358 = vmatprep.subr.bf16.mxu1 %v685_v17 }
 0x33a   :  { %1359 = vmatpush3.bf16.msra.mxu1 %v685_v17 }
 0x33b   :  { %v1348_v18 = vpop.f32.mrb[28].mxu0  ;;  %1360 = vmatprep.subr.bf16.mxu1 %v686_v14 }
 0x33c   :  { %v666_v19 = vpop.f32.mrb[29].mxu0 }
 0x33d   :  { %v1349_v20 = vpop.f32.mrb[30].mxu0 }
 0x33e   :  { %v688_v21 = vpack.c.bf16 %v1349_v20, %v1348_v18  ;;  %v669_v22 = vpop.f32.mrb[31].mxu0  ;;  %1361 = vmatpush3.bf16.msra.mxu1 %v686_v14 }
 0x33f   :  { %v687_v23 = vpack.c.bf16 %v669_v22, %v666_v19 }
 0x341   :  { %1362 = vmatprep.subr.bf16.mxu1 %v687_v23 }
 0x342   :  { %1363 = vmatpush3.bf16.msra.mxu1 %v687_v23 }
 0x343   :  { %1364 = vmatprep.subr.bf16.mxu1 %v688_v21 }
 0x346   :  { %1365 = vmatpush3.bf16.msra.mxu1 %v688_v21 }
 0x349   :  { %1367 = vmatmul.mubr.bf16.vlgmr.msra.gmra.mrb[16].mxu1 %v1748_v47 }
 0x34a   :  { %1370 = vmatprep.mubr.bf16.mxu1 %v1750_v48 }
 0x351   :  { %1371 = vmatmul.mubr.bf16.gmra.mrb[20].mxu1 %v1754_v49 }
 0x352   :  { %1374 = vmatprep.mubr.bf16.mxu1 %v1756_v50 }
 0x359   :  { %1375 = vmatmul.mubr.bf16.gmra.mrb[24].mxu1 %v1760_v51 }
 0x35a   :  { %1378 = vmatprep.mubr.bf16.mxu1 %v1762_v52 }
 0x361   :  { %1379 = vmatmul.mubr.bf16.gmra.mrb[28].mxu1 %v1766_v53 }
 0x362   :  { %1430 = vmatprep.mubr.bf16.mxu1 %v1745_v16 }
 0x41c   :  { %v1368_v27 = vpop.f32.mrb[16].mxu1 }
 0x41d   :  { %v740_v28 = vadd.f32 %v1368_v27, %v1148_v26  ;;  %v731_v29 = vpop.f32.mrb[17].mxu1 }
 0x41e   :  { %v732_v30 = vadd.f32 %v1148_v26, %v731_v29  ;;  %v1369_v31 = vpop.f32.mrb[18].mxu1 }
 0x41f   :  { %v743_v32 = vadd.f32 %v1369_v31, %v1148_v26  ;;  %v734_v33 = vpop.f32.mrb[19].mxu1  ;;  %v796_v35 = vmax.f32 %v740_v28, 0.0 }
 0x420   :  { %v735_v34 = vadd.f32 %v1148_v26, %v734_v33  ;;  %v794_v36 = vmax.f32 %v732_v30, 0.0 }
 0x421   :  { %v797_v16 = vmax.f32 %v743_v32, 0.0 }
 0x422   :  { %v795_v37 = vmax.f32 %v735_v34, 0.0 }
 0x423   :  { %v811_v38 = vpack.c.bf16 %v797_v16, %v796_v35 }
 0x424   :  { %v810_v39 = vpack.c.bf16 %v795_v37, %v794_v36  ;;  %v1372_v40 = vpop.f32.mrb[20].mxu1 }
 0x425   :  { %v756_v41 = vadd.f32 %v1372_v40, %v1148_v26  ;;  %v747_v42 = vpop.f32.mrb[21].mxu1 }
 0x426   :  { %v748_v43 = vadd.f32 %v1148_v26, %v747_v42  ;;  %v1373_v44 = vpop.f32.mrb[22].mxu1  ;;  %1398 = vmatprep.mubr.bf16.mxu0 %v810_v39 }
 0x427   :  { %v759_v45 = vadd.f32 %v1373_v44, %v1148_v26  ;;  %v750_v46 = vpop.f32.mrb[23].mxu1  ;;  %1399 = vmatmul.mubr.bf16.vlgmr.msra.gmra.mrb[32].mxu0 %v811_v38  ;;  %v800_v55 = vmax.f32 %v756_v41, 0.0 }
 0x428   :  { %v751_v54 = vadd.f32 %v1148_v26, %v750_v46  ;;  %v798_v58 = vmax.f32 %v748_v43, 0.0 }
 0x429   :  { %v801_v57 = vmax.f32 %v759_v45, 0.0 }
 0x42a   :  { %v799_v59 = vmax.f32 %v751_v54, 0.0 }
 0x42b   :  { %v813_v60 = vpack.c.bf16 %v801_v57, %v800_v55  ;;  %v1157_v57 = vld [vmem:[%s1848_s6] ss:$0 sm:$0xff] }
 0x42c   :  { %v812_v61 = vpack.c.bf16 %v799_v59, %v798_v58  ;;  %v1376_v56 = vpop.f32.mrb[24].mxu1 }
 0x42d   :  { %v772_v62 = vadd.f32 %v1376_v56, %v1148_v26  ;;  %v763_v63 = vpop.f32.mrb[25].mxu1 }
 0x42e   :  { %v764_v0 = vadd.f32 %v1148_v26, %v763_v63  ;;  %v1377_v1 = vpop.f32.mrb[26].mxu1  ;;  %1402 = vmatprep.mubr.bf16.mxu0 %v812_v61 }
 0x42f   :  { %v775_v2 = vadd.f32 %v1377_v1, %v1148_v26  ;;  %v766_v3 = vpop.f32.mrb[27].mxu1  ;;  %1403 = vmatmul.mubr.bf16.gmra.mrb[36].mxu0 %v813_v60  ;;  %v804_v5 = vmax.f32 %v772_v62, 0.0 }
 0x430   :  { %v767_v4 = vadd.f32 %v1148_v26, %v766_v3  ;;  %v802_v7 = vmax.f32 %v764_v0, 0.0 }
 0x431   :  { %v805_v6 = vmax.f32 %v775_v2, 0.0 }
 0x432   :  { %v803_v8 = vmax.f32 %v767_v4, 0.0 }
 0x433   :  { %v815_v9 = vpack.c.bf16 %v805_v6, %v804_v5 }
 0x434   :  { %v814_v10 = vpack.c.bf16 %v803_v8, %v802_v7  ;;  %v1380_v11 = vpop.f32.mrb[28].mxu1 }
 0x435   :  { %v788_v12 = vadd.f32 %v1380_v11, %v1148_v26  ;;  %v779_v13 = vpop.f32.mrb[29].mxu1 }
 0x436   :  { %v780_v14 = vadd.f32 %v1148_v26, %v779_v13  ;;  %v1381_v15 = vpop.f32.mrb[30].mxu1  ;;  %1406 = vmatprep.mubr.bf16.mxu0 %v814_v10 }
 0x437   :  { %v791_v17 = vadd.f32 %v1381_v15, %v1148_v26  ;;  %v782_v18 = vpop.f32.mrb[31].mxu1  ;;  %1407 = vmatmul.mubr.bf16.gmra.mrb[40].mxu0 %v815_v9  ;;  %v808_v20 = vmax.f32 %v788_v12, 0.0 }
 0x438   :  { %v783_v19 = vadd.f32 %v1148_v26, %v782_v18  ;;  %v806_v22 = vmax.f32 %v780_v14, 0.0 }
 0x439   :  { %v809_v21 = vmax.f32 %v791_v17, 0.0 }
 0x43a   :  { %v807_v23 = vmax.f32 %v783_v19, 0.0 }
 0x43b   :  { %v817_v24 = vpack.c.bf16 %v809_v21, %v808_v20 }
 0x43c   :  { %v816_v25 = vpack.c.bf16 %v807_v23, %v806_v22 }
 0x43e   :  { %1410 = vmatprep.mubr.bf16.mxu0 %v816_v25 }
 0x43f   :  { %1411 = vmatmul.mubr.bf16.gmra.mrb[44].mxu0 %v817_v24 }
 0x4fa   :  { %v1400_v27 = vpop.f32.mrb[32].mxu0 }
 0x4fb   :  { %v916_v28 = vpop.f32.mrb[33].mxu0 }
 0x4fc   :  { %v1401_v29 = vpop.f32.mrb[34].mxu0 }
 0x4fd   :  { %v980_v30 = vpack.c.bf16 %v1401_v29, %v1400_v27  ;;  %v919_v31 = vpop.f32.mrb[35].mxu0 }
 0x4fe   :  { %v979_v32 = vpack.c.bf16 %v919_v31, %v916_v28 }
 0x500   :  { %1414 = vmatprep.subr.bf16.mxu1 %v979_v32 }
 0x501   :  { %1415 = vmatpush3.bf16.msra.mxu1 %v979_v32 }
 0x502   :  { %v1404_v33 = vpop.f32.mrb[36].mxu0  ;;  %1416 = vmatprep.subr.bf16.mxu1 %v980_v30 }
 0x503   :  { %v932_v34 = vpop.f32.mrb[37].mxu0 }
 0x504   :  { %v1405_v26 = vpop.f32.mrb[38].mxu0 }
 0x505   :  { %v982_v35 = vpack.c.bf16 %v1405_v26, %v1404_v33  ;;  %v935_v16 = vpop.f32.mrb[39].mxu0  ;;  %1417 = vmatpush3.bf16.msra.mxu1 %v980_v30 }
 0x506   :  { %v981_v36 = vpack.c.bf16 %v935_v16, %v932_v34 }
 0x508   :  { %1418 = vmatprep.subr.bf16.mxu1 %v981_v36 }
 0x509   :  { %1419 = vmatpush3.bf16.msra.mxu1 %v981_v36 }
 0x50a   :  { %v1408_v37 = vpop.f32.mrb[40].mxu0  ;;  %1420 = vmatprep.subr.bf16.mxu1 %v982_v35 }
 0x50b   :  { %v948_v38 = vpop.f32.mrb[41].mxu0 }
 0x50c   :  { %v1409_v39 = vpop.f32.mrb[42].mxu0 }
 0x50d   :  { %v984_v40 = vpack.c.bf16 %v1409_v39, %v1408_v37  ;;  %v951_v41 = vpop.f32.mrb[43].mxu0  ;;  %1421 = vmatpush3.bf16.msra.mxu1 %v982_v35 }
 0x50e   :  { %v983_v42 = vpack.c.bf16 %v951_v41, %v948_v38 }
 0x510   :  { %1422 = vmatprep.subr.bf16.mxu1 %v983_v42 }
 0x511   :  { %1423 = vmatpush3.bf16.msra.mxu1 %v983_v42 }
 0x512   :  { %v1412_v43 = vpop.f32.mrb[44].mxu0  ;;  %1424 = vmatprep.subr.bf16.mxu1 %v984_v40 }
 0x513   :  { %v964_v44 = vpop.f32.mrb[45].mxu0 }
 0x514   :  { %v1413_v45 = vpop.f32.mrb[46].mxu0 }
 0x515   :  { %v986_v46 = vpack.c.bf16 %v1413_v45, %v1412_v43  ;;  %v967_v54 = vpop.f32.mrb[47].mxu0  ;;  %1425 = vmatpush3.bf16.msra.mxu1 %v984_v40 }
 0x516   :  { %v985_v55 = vpack.c.bf16 %v967_v54, %v964_v44 }
 0x518   :  { %1426 = vmatprep.subr.bf16.mxu1 %v985_v55 }
 0x519   :  { %1427 = vmatpush3.bf16.msra.mxu1 %v985_v55 }
 0x51a   :  { %1428 = vmatprep.subr.bf16.mxu1 %v986_v46 }
 0x51d   :  { %1429 = vmatpush3.bf16.msra.mxu1 %v986_v46 }
 0x520   :  { %1431 = vmatmul.mubr.bf16.vlgmr.msra.gmra.mrb[32].mxu1 %v1748_v47 }
 0x521   :  { %1434 = vmatprep.mubr.bf16.mxu1 %v1750_v48 }
 0x528   :  { %1435 = vmatmul.mubr.bf16.gmra.mrb[36].mxu1 %v1754_v49 }
 0x529   :  { %1438 = vmatprep.mubr.bf16.mxu1 %v1756_v50 }
 0x530   :  { %1439 = vmatmul.mubr.bf16.gmra.mrb[40].mxu1 %v1760_v51 }
 0x531   :  { %1442 = vmatprep.mubr.bf16.mxu1 %v1762_v52 }
 0x538   :  { %1443 = vmatmul.mubr.bf16.gmra.mrb[44].mxu1 %v1766_v53 }
 0x5f3   :  { %v1432_v58 = vpop.f32.mrb[32].mxu1 }
 0x5f4   :  { %v1037_v59 = vadd.f32 %v1432_v58, %v1157_v57  ;;  %v1028_v60 = vpop.f32.mrb[33].mxu1 }
 0x5f5   :  { %v1029_v47 = vadd.f32 %v1157_v57, %v1028_v60  ;;  %v1433_v61 = vpop.f32.mrb[34].mxu1 }
 0x5f6   :  { %1093 = vst [vmem:[%s1849_s7 + $0x10] sm:$0xff] %v1037_v59  ;;  %v1040_v48 = vadd.f32 %v1433_v61, %v1157_v57  ;;  %v1031_v49 = vpop.f32.mrb[35].mxu1 }
 0x5f7   :  { %1091 = vst [vmem:[%s1849_s7] sm:$0xff] %v1029_v47  ;;  %v1032_v50 = vadd.f32 %v1157_v57, %v1031_v49 }
 0x5f8   :  { %1094 = vst [vmem:[%s1849_s7 + $0x18] sm:$0xff] %v1040_v48 }
 0x5f9   :  { %1092 = vst [vmem:[%s1849_s7 + $0x8] sm:$0xff] %v1032_v50 }
 0x5fb   :  { %v1436_v51 = vpop.f32.mrb[36].mxu1 }
 0x5fc   :  { %v1053_v52 = vadd.f32 %v1436_v51, %v1157_v57  ;;  %v1044_v53 = vpop.f32.mrb[37].mxu1 }
 0x5fd   :  { %v1045_v56 = vadd.f32 %v1157_v57, %v1044_v53  ;;  %v1437_v62 = vpop.f32.mrb[38].mxu1 }
 0x5fe   :  { %1097 = vst [vmem:[%s1849_s7 + $0x30] sm:$0xff] %v1053_v52  ;;  %v1056_v63 = vadd.f32 %v1437_v62, %v1157_v57  ;;  %v1047_v0 = vpop.f32.mrb[39].mxu1 }
 0x5ff   :  { %1095 = vst [vmem:[%s1849_s7 + $0x20] sm:$0xff] %v1045_v56  ;;  %v1048_v1 = vadd.f32 %v1157_v57, %v1047_v0 }
 0x600   :  { %1098 = vst [vmem:[%s1849_s7 + $0x38] sm:$0xff] %v1056_v63 }
 0x601   :  { %1096 = vst [vmem:[%s1849_s7 + $0x28] sm:$0xff] %v1048_v1 }
 0x603   :  { %v1440_v2 = vpop.f32.mrb[40].mxu1 }
 0x604   :  { %v1069_v3 = vadd.f32 %v1440_v2, %v1157_v57  ;;  %v1060_v4 = vpop.f32.mrb[41].mxu1 }
 0x605   :  { %v1061_v5 = vadd.f32 %v1157_v57, %v1060_v4  ;;  %v1441_v6 = vpop.f32.mrb[42].mxu1 }
 0x606   :  { %1101 = vst [vmem:[%s1849_s7 + $0x50] sm:$0xff] %v1069_v3  ;;  %v1072_v7 = vadd.f32 %v1441_v6, %v1157_v57  ;;  %v1063_v8 = vpop.f32.mrb[43].mxu1 }
 0x607   :  { %1099 = vst [vmem:[%s1849_s7 + $0x40] sm:$0xff] %v1061_v5  ;;  %v1064_v9 = vadd.f32 %v1157_v57, %v1063_v8 }
 0x608   :  { %1102 = vst [vmem:[%s1849_s7 + $0x58] sm:$0xff] %v1072_v7 }
 0x609   :  { %1100 = vst [vmem:[%s1849_s7 + $0x48] sm:$0xff] %v1064_v9 }
 0x60b   :  { %v1444_v10 = vpop.f32.mrb[44].mxu1 }
 0x60c   :  { %v1085_v11 = vadd.f32 %v1444_v10, %v1157_v57  ;;  %v1076_v12 = vpop.f32.mrb[45].mxu1 }
 0x60d   :  { %v1077_v13 = vadd.f32 %v1157_v57, %v1076_v12  ;;  %v1445_v14 = vpop.f32.mrb[46].mxu1 }
 0x60e   :  { %1105 = vst [vmem:[%s1849_s7 + $0x70] sm:$0xff] %v1085_v11  ;;  %v1088_v15 = vadd.f32 %v1445_v14, %v1157_v57  ;;  %v1079_v17 = vpop.f32.mrb[47].mxu1 }
 0x60f   :  { %1103 = vst [vmem:[%s1849_s7 + $0x60] sm:$0xff] %v1077_v13  ;;  %v1080_v18 = vadd.f32 %v1157_v57, %v1079_v17 }
 0x610   :  { %1106 = vst [vmem:[%s1849_s7 + $0x78] sm:$0xff] %v1088_v15 }
 0x611   :  { %1104 = vst [vmem:[%s1849_s7 + $0x68] sm:$0xff] %v1080_v18 }
 0x612   :  { %1111 = vsyncpa [#allocation3], 1 }
 0x613   :  { %1112 = vsyncpa [#allocation5], 1 }
 0x614   :  { %1113 = vsyncpa [#allocation8], 1 }

</bundles_post_ra>
